<compile_context>
chip_gen: v5e
topology: v5e:2x2
jax: 0.10.0
libtpu: 0.0.40
codegen_flags: <defaults>
</compile_context>

<pallas_src>
import functools
import jax
import jax.numpy as jnp
from jax.experimental import pallas as pl
from jax.experimental.pallas import tpu as pltpu

LEAK = 0.2
EPS = 1e-8
FACTORS = [1, 1, 1, 1, 1 / 2, 1 / 4, 1 / 8, 1 / 16, 1 / 32]

_VMEM_LIMIT = 48 * 1024 * 1024      # scoped VMEM limit (leaves headroom on v7x 64 MiB)
_BLOCK_BUDGET = 20 * 1024 * 1024    # rough per-grid-step live-block budget


def _leaky(x):
    return jnp.where(x > 0, x, LEAK * x)


def _pixelnorm_lastdim(x):
    return x * jax.lax.rsqrt(jnp.mean(x * x, axis=-1, keepdims=True) + EPS)


def _row_tile(H, bytes_per_row, block_rows=None):
    """Largest power-of-two divisor of H whose row-tile fits the VMEM budget."""
    if block_rows is not None:
        return min(H, block_rows)
    th = H
    while th > 8 and th * bytes_per_row > _BLOCK_BUDGET:
        th //= 2
    return th


# ---------------------------------------------------------------------------
# Pallas kernels
# ---------------------------------------------------------------------------
def _initial_kernel(z_ref, w_ref, b_ref, o_ref):
    # PixelNorm over z, ConvTranspose2d(z, C, 4, 1, 0) as a matmul, bias, LeakyReLU.
    z = z_ref[...].astype(jnp.float32)
    zn = z * jax.lax.rsqrt(jnp.mean(z * z, axis=1, keepdims=True) + EPS)
    y = jnp.dot(zn, w_ref[...], preferred_element_type=jnp.float32) + b_ref[...]
    o_ref[...] = _leaky(y)


def _conv3_kernel(x_hbm, w_ref, b_ref, o_ref, xpad, sem,
                  *, H, W, TH, cin, cout, leaky, pn):
    # Row-tiled 3x3 conv.  x_hbm: (N, H, W, cin) bf16 in HBM.
    # xpad scratch: (TH+2, W, cin) bf16 -- rows [1, TH+1) are the tile, rows 0 and
    # TH+1 are the halo (DMA'd from neighbours or zeroed at the image border).
    n = pl.program_id(0)
    t = pl.program_id(1)
    nt = pl.num_programs(1)
    row0 = t * TH

    def main_copy():
        return pltpu.make_async_copy(
            x_hbm.at[n, pl.ds(row0, TH), :, :], xpad.at[pl.ds(1, TH)], sem.at[0])

    def top_copy():
        return pltpu.make_async_copy(
            x_hbm.at[n, pl.ds(jnp.maximum(row0 - 1, 0), 1), :, :],
            xpad.at[pl.ds(0, 1)], sem.at[1])

    def bot_copy():
        return pltpu.make_async_copy(
            x_hbm.at[n, pl.ds(jnp.minimum(row0 + TH, H - 1), 1), :, :],
            xpad.at[pl.ds(TH + 1, 1)], sem.at[2])

    main_copy().start()

    @pl.when(t > 0)
    def _():
        top_copy().start()

    @pl.when(t == 0)
    def _():
        xpad[0] = jnp.zeros((W, cin), xpad.dtype)

    @pl.when(t < nt - 1)
    def _():
        bot_copy().start()

    @pl.when(t == nt - 1)
    def _():
        xpad[TH + 1] = jnp.zeros((W, cin), xpad.dtype)

    main_copy().wait()

    @pl.when(t > 0)
    def _():
        top_copy().wait()

    @pl.when(t < nt - 1)
    def _():
        bot_copy().wait()

    # Fused zero-pad along W + im2col -> one MXU matmul over K*K*cin.
    xp = xpad[...]                                             # (TH+2, W, cin) bf16
    zc = jnp.zeros((TH + 2, 1, cin), xp.dtype)
    xpw = jnp.concatenate([zc, xp, zc], axis=1)                # (TH+2, W+2, cin)
    taps = [xpw[dy:dy + TH, dx:dx + W, :] for dy in range(3) for dx in range(3)]
    patches = jnp.concatenate(taps, axis=-1).reshape(TH * W, 9 * cin)

    acc = jnp.dot(patches, w_ref[...], preferred_element_type=jnp.float32)
    y = acc + b_ref[...]                                       # f32 epilogue
    if leaky:
        y = _leaky(y)
    if pn:
        y = _pixelnorm_lastdim(y)
    o_ref[...] = y.reshape(1, TH, W, cout).astype(o_ref.dtype)


def _rgb_fade_kernel(alpha_ref, bu_ref, bg_ref, ups_ref, gen_ref, wu_ref, wg_ref,
                     o_ref, *, n_img):
    # Fused: toRGB(upscaled), toRGB(generated), fade, tanh, NHWC->NCHW emit.
    alpha = alpha_ref[0]
    ups = ups_ref[0].astype(jnp.float32)        # (TH, W, Cu)
    gen = gen_ref[0].astype(jnp.float32)        # (TH, W, Cg)
    wu = wu_ref[...]                            # (n_img, Cu) f32
    wg = wg_ref[...]                            # (n_img, Cg) f32
    for c in range(n_img):                      # 1x1 conv as a lane reduction
        yu = jnp.sum(ups * wu[c], axis=-1) + bu_ref[c]
        yg = jnp.sum(gen * wg[c], axis=-1) + bg_ref[c]
        o_ref[0, c] = jnp.tanh(alpha * yg + (1.0 - alpha) * yu)


def _rgb_kernel(b_ref, x_ref, w_ref, o_ref, *, n_img):
    # toRGB only (steps == 0 path), NCHW emit, no tanh.
    x = x_ref[0].astype(jnp.float32)
    w = w_ref[...]
    for c in range(n_img):
        o_ref[0, c] = jnp.sum(x * w[c], axis=-1) + b_ref[c]


# ---------------------------------------------------------------------------
# Pallas wrappers
# ---------------------------------------------------------------------------
def initial_stage(z, w_flat, b_flat):
    # z: (N, z_dim) f32, w_flat: (z_dim, C*16) f32, b_flat: (1, C*16) f32
    N = z.shape[0]
    F = w_flat.shape[1]
    return pl.pallas_call(
        _initial_kernel,
        out_shape=jax.ShapeDtypeStruct((N, F), jnp.float32),
    )(z, w_flat, b_flat)


def ws_conv3(x, p, *, leaky, pn, block_rows=None):
    # 3x3 stride-1 pad-1 WSConv2d + bias (+LeakyReLU)(+PixelNorm).  NHWC, bf16 out.
    N, H, W, cin = x.shape
    assert p["k"] == 3
    cout = p["w"].shape[-1]
    w2 = (p["w"] * p["scale"]).astype(jnp.bfloat16).reshape(9 * cin, cout)
    b2 = p["b"].reshape(1, cout).astype(jnp.float32)

    bytes_per_row = W * (cin * 2 + 9 * cin * 2 + 2 * cout * 4 + 2 * cout * 2)
    TH = _row_tile(H, bytes_per_row, block_rows)
    assert H % TH == 0
    T = H // TH

    kern = functools.partial(_conv3_kernel, H=H, W=W, TH=TH,
                             cin=cin, cout=cout, leaky=leaky, pn=pn)
    return pl.pallas_call(
        kern,
        grid=(N, T),
        in_specs=[
            pl.BlockSpec(memory_space=pl.ANY),                     # activation in HBM
            pl.BlockSpec((9 * cin, cout), lambda n, t: (0, 0)),    # bf16 weights
            pl.BlockSpec((1, cout), lambda n, t: (0, 0)),          # f32 bias
        ],
        out_specs=pl.BlockSpec((1, TH, W, cout), lambda n, t: (n, t, 0, 0)),
        out_shape=jax.ShapeDtypeStruct((N, H, W, cout), jnp.bfloat16),
        scratch_shapes=[
            pltpu.VMEM((TH + 2, W, cin), jnp.bfloat16),
            pltpu.SemaphoreType.DMA((3,)),
        ],
        compiler_params=pltpu.CompilerParams(
            dimension_semantics=("parallel", "parallel"),
            vmem_limit_bytes=_VMEM_LIMIT),
    )(x.astype(jnp.bfloat16), w2, b2)


def rgb_fade(alpha, upscaled, generated, p_up, p_gen, *, block_rows=None):
    # Fused toRGB x2 + fade + tanh, emitting NCHW directly.
    N, H, W, cu = upscaled.shape
    cg = generated.shape[-1]
    n_img = p_gen["w"].shape[-1]
    wu = (p_up["w"].reshape(cu, n_img) * p_up["scale"]).T.astype(jnp.float32)
    wg = (p_gen["w"].reshape(cg, n_img) * p_gen["scale"]).T.astype(jnp.float32)
    bu = p_up["b"].astype(jnp.float32)
    bg = p_gen["b"].astype(jnp.float32)
    a = jnp.asarray(alpha, jnp.float32).reshape(1)

    bytes_per_row = W * (2 * cu * 2 + 2 * cg * 2 + (cu + cg) * 4 + 3 * n_img * 4)
    TH = _row_tile(H, bytes_per_row, block_rows)
    assert H % TH == 0
    T = H // TH

    kern = functools.partial(_rgb_fade_kernel, n_img=n_img)
    return pl.pallas_call(
        kern,
        grid=(N, T),
        in_specs=[
            pl.BlockSpec(memory_space=pltpu.MemorySpace.SMEM),     # alpha
            pl.BlockSpec(memory_space=pltpu.MemorySpace.SMEM),     # bias (upscaled rgb)
            pl.BlockSpec(memory_space=pltpu.MemorySpace.SMEM),     # bias (generated rgb)
            pl.BlockSpec((1, TH, W, cu), lambda n, t: (n, t, 0, 0)),
            pl.BlockSpec((1, TH, W, cg), lambda n, t: (n, t, 0, 0)),
            pl.BlockSpec((n_img, cu), lambda n, t: (0, 0)),
            pl.BlockSpec((n_img, cg), lambda n, t: (0, 0)),
        ],
        out_specs=pl.BlockSpec((1, n_img, TH, W), lambda n, t: (n, 0, t, 0)),
        out_shape=jax.ShapeDtypeStruct((N, n_img, H, W), jnp.float32),
        compiler_params=pltpu.CompilerParams(
            dimension_semantics=("parallel", "parallel"),
            vmem_limit_bytes=_VMEM_LIMIT),
    )(a, bu, bg, upscaled.astype(jnp.bfloat16), generated.astype(jnp.bfloat16), wu, wg)


def rgb_to_nchw(x, p, *, block_rows=None):
    # toRGB (1x1 WSConv) emitting NCHW, used for the steps == 0 path.
    N, H, W, cin = x.shape
    n_img = p["w"].shape[-1]
    w2 = (p["w"].reshape(cin, n_img) * p["scale"]).T.astype(jnp.float32)
    b2 = p["b"].astype(jnp.float32)

    bytes_per_row = W * (2 * cin * 2 + cin * 4 + 3 * n_img * 4)
    TH = _row_tile(H, bytes_per_row, block_rows)
    assert H % TH == 0
    T = H // TH

    kern = functools.partial(_rgb_kernel, n_img=n_img)
    return pl.pallas_call(
        kern,
        grid=(N, T),
        in_specs=[
            pl.BlockSpec(memory_space=pltpu.MemorySpace.SMEM),     # bias
            pl.BlockSpec((1, TH, W, cin), lambda n, t: (n, t, 0, 0)),
            pl.BlockSpec((n_img, cin), lambda n, t: (0, 0)),
        ],
        out_specs=pl.BlockSpec((1, n_img, TH, W), lambda n, t: (n, 0, t, 0)),
        out_shape=jax.ShapeDtypeStruct((N, n_img, H, W), jnp.float32),
        compiler_params=pltpu.CompilerParams(
            dimension_semantics=("parallel", "parallel"),
            vmem_limit_bytes=_VMEM_LIMIT),
    )(b2, x.astype(jnp.bfloat16), w2)


def upsample2x(x):
    # nearest neighbour, NHWC, bf16 -- XLA glue.  TODO(synk): fuse into next conv.
    return jnp.repeat(jnp.repeat(x, 2, axis=1), 2, axis=2)


# ---------------------------------------------------------------------------
# Parameters (deterministic, synthetic)
# ---------------------------------------------------------------------------
def make_wsconv(key, cin, cout, k, gain=2):
    w_oihw = jax.random.normal(key, (cout, cin, k, k), jnp.float32)   # nn.init.normal_
    return dict(
        w=jnp.transpose(w_oihw, (2, 3, 1, 0)),          # HWIO
        b=jnp.zeros((cout,), jnp.float32),               # nn.init.zeros_
        scale=float((gain / (cin * k * k)) ** 0.5),
        k=k,
    )


def init_generator_params(key, z_dim, in_channels, img_channels=3):
    keys = iter(jax.random.split(key, 4 + 3 * (len(FACTORS) - 1)))
    params = {}
    wT = 0.05 * jax.random.normal(next(keys), (z_dim, in_channels, 4, 4), jnp.float32)
    bT = jnp.zeros((in_channels,), jnp.float32)
    params["initial_convT"] = (wT, bT)
    params["initial_ws"] = make_wsconv(next(keys), in_channels, in_channels, 3)
    rgb = [make_wsconv(next(keys), in_channels, img_channels, 1)]
    prog = []
    for i in range(len(FACTORS) - 1):
        cin = int(in_channels * FACTORS[i])
        cout = int(in_channels * FACTORS[i + 1])
        prog.append((make_wsconv(next(keys), cin, cout, 3),
                     make_wsconv(next(keys), cout, cout, 3)))
        rgb.append(make_wsconv(next(keys), cout, img_channels, 1))
    params["prog"] = prog
    params["rgb"] = rgb
    return params


# ---------------------------------------------------------------------------
# Generator forward (Pallas)
# ---------------------------------------------------------------------------
def generator_forward(params, x_nchw, alpha, steps, block_rows=None):
    N, z_dim = x_nchw.shape[0], x_nchw.shape[1]
    z = x_nchw.reshape(N, z_dim).astype(jnp.float32)

    wT, bT = params["initial_convT"]
    C = wT.shape[1]
    w_flat = wT.reshape(z_dim, C * 16)
    b_flat = jnp.repeat(bT, 16).reshape(1, C * 16)
    y = initial_stage(z, w_flat, b_flat)                        # (N, C*16) f32
    out = jnp.transpose(y.reshape(N, C, 4, 4), (0, 2, 3, 1))    # NHWC (N,4,4,C)
    out = ws_conv3(out.astype(jnp.bfloat16), params["initial_ws"],
                   leaky=True, pn=True, block_rows=block_rows)

    if steps == 0:
        return rgb_to_nchw(out, params["rgb"][0], block_rows=block_rows)

    for step in range(steps):
        upscaled = upsample2x(out)
        c1, c2 = params["prog"][step]
        h = ws_conv3(upscaled, c1, leaky=True, pn=True, block_rows=block_rows)
        out = ws_conv3(h, c2, leaky=True, pn=True, block_rows=block_rows)

    return rgb_fade(alpha, upscaled, out,
                    params["rgb"][steps - 1], params["rgb"][steps],
                    block_rows=block_rows)


# ---------------------------------------------------------------------------
# Pure-JAX reference (mirrors the kernel's bf16-in / f32-accumulate precision)
# ---------------------------------------------------------------------------
def _wsconv3_ref(x_bf16, p, leaky, pn):
    w = (p["w"] * p["scale"]).astype(jnp.bfloat16).astype(jnp.float32)
    y = jax.lax.conv_general_dilated(
        x_bf16.astype(jnp.float32), w, (1, 1), "SAME",
        dimension_numbers=("NHWC", "HWIO", "NHWC"))
    y = y + p["b"][None, None, None, :]
    if leaky:
        y = _leaky(y)
    if pn:
        y = _pixelnorm_lastdim(y)
    return y.astype(jnp.bfloat16)


def _rgb_ref(x_bf16, p):
    w = (p["w"] * p["scale"]).astype(jnp.float32)
    y = jax.lax.conv_general_dilated(
        x_bf16.astype(jnp.float32), w, (1, 1), "VALID",
        dimension_numbers=("NHWC", "HWIO", "NHWC"))
    return y + p["b"][None, None, None, :]


def generator_ref(params, x_nchw, alpha, steps):
    N, z_dim = x_nchw.shape[0], x_nchw.shape[1]
    z = x_nchw.reshape(N, z_dim).astype(jnp.float32)
    zn = z * jax.lax.rsqrt(jnp.mean(z * z, axis=1, keepdims=True) + EPS)
    wT, bT = params["initial_convT"]
    y = jnp.einsum("nc,cdhw->ndhw", zn, wT) + bT[None, :, None, None]
    out = jnp.transpose(_leaky(y), (0, 2, 3, 1)).astype(jnp.bfloat16)
    out = _wsconv3_ref(out, params["initial_ws"], True, True)
    if steps == 0:
        return jnp.transpose(_rgb_ref(out, params["rgb"][0]), (0, 3, 1, 2))
    for step in range(steps):
        upscaled = upsample2x(out)
        c1, c2 = params["prog"][step]
        out = _wsconv3_ref(_wsconv3_ref(upscaled, c1, True, True), c2, True, True)
    fu = _rgb_ref(upscaled, params["rgb"][steps - 1])
    fo = _rgb_ref(out, params["rgb"][steps])
    return jnp.transpose(jnp.tanh(alpha * fo + (1 - alpha) * fu), (0, 3, 1, 2))


# ---------------------------------------------------------------------------
if __name__ == "__main__":
    key = jax.random.PRNGKey(0)
    z_dim, in_channels, img_channels = 32, 32, 3
    N, steps, alpha = 2, 2, 0.5

    kp, kx = jax.random.split(key)
    params = init_generator_params(kp, z_dim, in_channels, img_channels)
    x = jax.random.normal(kx, (N, z_dim, 1, 1), jnp.float32)   # PyTorch-style latent

    out = jax.block_until_ready(generator_forward(params, x, alpha, steps))
    ref = jax.block_until_ready(generator_ref(params, x, alpha, steps))
    assert out.shape == (N, img_channels, 4 * 2 ** steps, 4 * 2 ** steps), out.shape
    err = float(jnp.max(jnp.abs(out - ref)))
    assert jnp.allclose(out, ref, rtol=5e-3, atol=5e-3), err

    # Exercise the row-tiled / halo-DMA path (forces 2 row tiles at 16x16).
    out_t = jax.block_until_ready(
        generator_forward(params, x, alpha, steps, block_rows=8))
    err_t = float(jnp.max(jnp.abs(out_t - ref)))
    assert jnp.allclose(out_t, ref, rtol=5e-3, atol=5e-3), err_t

    # steps == 0 path (initial RGB only, no fade/tanh).
    out0 = jax.block_until_ready(generator_forward(params, x, alpha, 0))
    ref0 = jax.block_until_ready(generator_ref(params, x, alpha, 0))
    assert jnp.allclose(out0, ref0, rtol=5e-3, atol=5e-3)

    print("KERNEL_OK")
</pallas_src>

<mosaic_0001>
module attributes {stable_mosaic.version = 11 : i64} {
  func.func @_initial_kernel(%arg0: memref<2x32xf32, #tpu.memory_space<vmem>>, %arg1: memref<32x512xf32, #tpu.memory_space<vmem>>, %arg2: memref<1x512xf32, #tpu.memory_space<vmem>>, %arg3: memref<2x512xf32, #tpu.memory_space<vmem>>) attributes {dimension_semantics = [], scalar_prefetch = 0 : i64, scratch_operands = 0 : i64, tpu.core_type = #tpu.core_type<tc>} {
    %c0 = arith.constant 0 : index
    %c0_0 = arith.constant 0 : index
    %0 = vector.load %arg0[%c0, %c0_0] : memref<2x32xf32, #tpu.memory_space<vmem>>, vector<2x32xf32>
    %1 = arith.mulf %0, %0 : vector<2x32xf32>
    %cst = arith.constant dense<0.000000e+00> : vector<2xf32>
    %2 = vector.multi_reduction <add>, %1, %cst [1] : vector<2x32xf32> to vector<2xf32>
    %3 = vector.shape_cast %2 : vector<2xf32> to vector<2x1xf32>
    %cst_1 = arith.constant 3.200000e+01 : f32
    %4 = vector.broadcast %cst_1 : f32 to vector<2x1xf32>
    %5 = arith.divf %3, %4 : vector<2x1xf32>
    %cst_2 = arith.constant 9.99999993E-9 : f32
    %6 = vector.broadcast %cst_2 : f32 to vector<2x1xf32>
    %7 = arith.addf %5, %6 : vector<2x1xf32>
    %8 = math.rsqrt %7 : vector<2x1xf32>
    %9 = vector.broadcast %8 : vector<2x1xf32> to vector<2x32xf32>
    %10 = arith.mulf %0, %9 : vector<2x32xf32>
    %c0_3 = arith.constant 0 : index
    %c0_4 = arith.constant 0 : index
    %11 = vector.load %arg1[%c0_3, %c0_4] : memref<32x512xf32, #tpu.memory_space<vmem>>, vector<32x512xf32>
    %cst_5 = arith.constant dense<0.000000e+00> : vector<2x512xf32>
    %12 = tpu.matmul %10, %11, %cst_5 {dimension_numbers = #tpu.dot_dimension_numbers<[1], [0], [0], [1], [0, 0, 1, 1], [], []>} : vector<2x32xf32>, vector<32x512xf32>, vector<2x512xf32> -> vector<2x512xf32>
    %c0_6 = arith.constant 0 : index
    %c0_7 = arith.constant 0 : index
    %13 = vector.load %arg2[%c0_6, %c0_7] : memref<1x512xf32, #tpu.memory_space<vmem>>, vector<1x512xf32>
    %14 = vector.broadcast %13 : vector<1x512xf32> to vector<2x512xf32>
    %15 = arith.addf %12, %14 : vector<2x512xf32>
    %cst_8 = arith.constant 0.000000e+00 : f32
    %16 = vector.broadcast %cst_8 : f32 to vector<2x512xf32>
    %17 = arith.cmpf ogt, %15, %16 : vector<2x512xf32>
    %cst_9 = arith.constant 2.000000e-01 : f32
    %18 = vector.broadcast %cst_9 : f32 to vector<2x512xf32>
    %19 = arith.mulf %18, %15 : vector<2x512xf32>
    %20 = arith.select %17, %15, %19 : vector<2x512xi1>, vector<2x512xf32>
    %c0_10 = arith.constant 0 : index
    %c0_11 = arith.constant 0 : index
    %21 = vector.load %arg3[%c0_10, %c0_11] : memref<2x512xf32, #tpu.memory_space<vmem>>, vector<2x512xf32>
    tpu.vector_store %arg3[%c0_10, %c0_11], %20 {strides = array<i32>} : memref<2x512xf32, #tpu.memory_space<vmem>>, vector<2x512xf32>,
    return
  }
}

</mosaic_0001>

<bundles_post_ra>
// kernel: tpu_custom_call.1
= control target key start
LH: loop header
LB: loop body
LE: loop exit
PB: predicated region body
PF: predicated region fallthrough
CT: control target
= control target key end

     0   :  { %8 = vsyncpa [#allocation3], 0  ;;  %s395_s0 = inlined_call_operand.hbm [shape: f32[2,32], index: 0, kind: input, shape index: {}]   ;;  %s396_s1 = inlined_call_operand.hbm [shape: f32[32,512], index: 1, kind: input, shape index: {}]   ;;  %s397_s2 = inlined_call_operand.hbm [shape: f32[1,512], index: 2, kind: input, shape index: {}]   ;;  %s398_s3 = inlined_call_operand.hbm [shape: f32[2,512], index: 3, kind: output, shape index: {}]  }
   0x1   :  { %9 = vsyncpa [#allocation6], 0  ;;  %s26_s14 = sshll.u32 %s396_s1, 4  ;;  %s27_s14 = int_to_ptr.hbm [resolvable:$true] %s26_s14 }
   0x2   :  { %10 = vsyncpa [#allocation4], 0  ;;  %s356_s15 = smov [#allocation5]   ;;  %s16_s19 = sshll.u32 %s395_s0, 4  ;;  %s17_s19 = int_to_ptr.hbm [resolvable:$true] %s16_s19 }
   0x3   :  { %s28_s16 = sshll.u32 %s356_s15, 4  ;;  %s357_s20 = smov 512   ;;  %s29_s16 = int_to_ptr.vmem [resolvable:$true] %s28_s16 }
   0x4   :  { %s358_s21 = smov 32   ;;  %s359_s22 = smov [#allocation2]  }
   0x5   :  { %34 = dma.hbm_to_vmem [thread:$0]  %s27_s14, 2048, %s29_s16, [#allocation6], %s357_s20, %s357_s20, %s358_s21  }
   0x6   :  { %s18_s23 = sshll.u32 %s359_s22, 4  ;;  %s40_s26 = sshll.u32 %s397_s2, 4  ;;  %s19_s23 = int_to_ptr.vmem [resolvable:$true] %s18_s23  ;;  %s41_s26 = int_to_ptr.hbm [resolvable:$true] %s40_s26 }
   0x7   :  { %21 = dma.hbm_to_vmem [thread:$0]  %s17_s19, 32, %s19_s23, [#allocation3]  }
   0x8   :  { %s360_s1 = smov [#allocation7]  }
   0x9   :  { %s42_s27 = sshll.u32 %s360_s1, 4  ;;  %s43_s27 = int_to_ptr.vmem [resolvable:$true] %s42_s27 }
   0xa   :  { %45 = dma.hbm_to_vmem [thread:$0]  %s41_s26, 64, %s43_s27, [#allocation6]  }
   0xb   :  { %350 = dma.done.wait [#allocation3], 32  }
   0xc   :  { %351 = vsyncadd [#allocation3], 4294967264 }
   0xd   :  { %352 = dma.done.wait [#allocation6], 2112  }
   0xe   :  { %353 = vsyncadd [#allocation6], 4294965184  ;;  %v58_v0 = vld [vmem:[#allocation2] sm:$0x3]  ;;  %vm60_vm0 = vcmask 254976   ;;  %v361_v3 = vmov 32.0  }
   0xf   :  { %v59_v1 = vmul.f32 %v58_v0, %v58_v0  ;;  %250 = vrcp.f32 %v361_v3  ;;  %v96_v6 = vld [vmem:[#allocation5 + $0x60] sm:$0xff]  ;;  %v97_v7 = vld [vmem:[#allocation5 + $0x68] sm:$0xff]  ;;  %v98_v8 = vld [vmem:[#allocation5 + $0x70] sm:$0xff]  ;;  %vm110_vm5 = vcmask 261120   ;;  %vm213_vm10 = vcmask 1041408   ;;  %s362_s0 = smov [#allocation8]  }
  0x10   :  { %126 = vmatpush.msra.mxu0 %v96_v6  ;;  %146 = vmatpush.msra.mxu1 %v97_v7  ;;  %v99_v10 = vld [vmem:[#allocation5 + $0x78] sm:$0xff]  ;;  %v92_v11 = vld [vmem:[#allocation5 + $0x40] sm:$0xff]  ;;  %v93_v12 = vld [vmem:[#allocation5 + $0x48] sm:$0xff]  ;;  %vm215_vm11 = vcmask 1045508   ;;  %s226_s2 = sshll.u32 %s362_s0, 4  ;;  %s228_s30 = sshll.u32 %s398_s3, 4  ;;  %s227_s2 = int_to_ptr.vmem [resolvable:$true] %s226_s2  ;;  %s229_s30 = int_to_ptr.hbm [resolvable:$true] %s228_s30 }
  0x11   :  { %v61_v2 = vsel %vm60_vm0, %v59_v1, 0.0  ;;  %166 = vmatpush.msra.mxu2 %v98_v8  ;;  %186 = vmatpush.msra.mxu3 %v99_v10  ;;  %v94_v13 = vld [vmem:[#allocation5 + $0x50] sm:$0xff]  ;;  %v95_v14 = vld [vmem:[#allocation5 + $0x58] sm:$0xff]  ;;  %v88_v15 = vld [vmem:[#allocation5 + $0x20] sm:$0xff]  ;;  %vm217_vm12 = vcmask 1043456  }
  0x12   :  { %62 = vadd.xlane.f32.xlu0 %v61_v2  ;;  %127 = vmatpush.msra.mxu0 %v92_v11  ;;  %v89_v16 = vld [vmem:[#allocation5 + $0x28] sm:$0xff]  ;;  %v90_v17 = vld [vmem:[#allocation5 + $0x30] sm:$0xff]  ;;  %v91_v18 = vld [vmem:[#allocation5 + $0x38] sm:$0xff] }
  0x13   :  { %147 = vmatpush.msra.mxu1 %v93_v12  ;;  %167 = vmatpush.msra.mxu2 %v94_v13  ;;  %v84_v19 = vld [vmem:[#allocation5] sm:$0xff]  ;;  %v85_v21 = vld [vmem:[#allocation5 + $0x8] sm:$0xff]  ;;  %v86_v22 = vld [vmem:[#allocation5 + $0x10] sm:$0xff] }
  0x14   :  { %187 = vmatpush.msra.mxu3 %v95_v14  ;;  %128 = vmatpush.msra.mxu0 %v88_v15  ;;  %v87_v23 = vld [vmem:[#allocation5 + $0x18] sm:$0xff]  ;;  %v100_v37 = vld [vmem:[#allocation7] sm:$0xf] }
  0x15   :  { %v251_v4 = vpop.eup %250  ;;  %148 = vmatpush.msra.mxu1 %v89_v16  ;;  %168 = vmatpush.msra.mxu2 %v90_v17  ;;  %v103_v38 = vperm.slane %v100_v37, 1  ;;  %v102_v40 = vperm.slane %v100_v37, 0  ;;  %v104_v44 = vperm.slane %v100_v37, 2  ;;  %v105_v45 = vperm.slane %v100_v37, 3 }
  0x16   :  { %v65_v5 = vmul.f32 32.0, %v251_v4  ;;  %188 = vmatpush.msra.mxu3 %v91_v18  ;;  %129 = vmatpush.msra.mxu0 %v84_v19  ;;  %vm69_vm1 = vweird.f32 %v251_v4 }
  0x17   :  { %149 = vmatpush.msra.mxu1 %v85_v21  ;;  %169 = vmatpush.msra.mxu2 %v86_v22 }
  0x18   :  { %v66_v9 = vsub.f32 1.0, %v65_v5  ;;  %189 = vmatpush.msra.mxu3 %v87_v23 }
  0x1a   :  { %v67_v20 = vmul.f32 %v251_v4, %v66_v9 }
  0x1c   :  { %v68_v24 = vadd.f32 %v251_v4, %v67_v20 }
  0x1e   :  { %v70_v25 = vsel %vm69_vm1, %v251_v4, %v68_v24 }
  0x85   :  { %v63_v26 = vpop.xlane.xlu0 %62 }
  0x86   :  { %v71_v27 = vmul.f32 %v70_v25, %v63_v26 }
  0x88   :  { %v72_v28 = vadd.f32 1e-08, %v71_v27 }
  0x8a   :  { %252 = vrsqrt.f32 %v72_v28  ;;  %vm79_vm3 = vweird.f32 %v72_v28 }
  0x90   :  { %v253_v29 = vpop.eup %252 }
  0x91   :  { %v74_v30 = vmul.f32 %v253_v29, %v72_v28  ;;  %vm80_vm2 = vweird.f32 %v253_v29 }
  0x92   :  { %vm81_vm4 = vmor %vm79_vm3, %vm80_vm2 }
  0x93   :  { %v75_v31 = vmul.f32 %v253_v29, %v74_v30 }
  0x95   :  { %v76_v32 = vmul.f32 0.5, %v75_v31 }
  0x97   :  { %v77_v33 = vsub.f32 1.5, %v76_v32 }
  0x99   :  { %v78_v34 = vmul.f32 %v253_v29, %v77_v33 }
  0x9b   :  { %v82_v35 = vsel %vm81_vm4, %v253_v29, %v78_v34 }
  0x9c   :  { %v83_v36 = vmul.f32 %v82_v35, %v58_v0 }
  0x9e   :  { %239 = vmatmul.msk.f32.vlgmr.msra.gmra.mxu0 %vm110_vm5, %v83_v36  ;;  %240 = vmatmul.msk.f32.vlgmr.msra.gmra.mxu1 %vm110_vm5, %v83_v36 }
  0x9f   :  { %241 = vmatmul.msk.f32.vlgmr.msra.gmra.mxu2 %vm110_vm5, %v83_v36  ;;  %242 = vmatmul.msk.f32.vlgmr.msra.gmra.mxu3 %vm110_vm5, %v83_v36 }
 0x11b   :  { %v151_v39 = vpop.f32.mrf.mxu1  ;;  %v131_v42 = vpop.f32.mrf.mxu0 }
 0x11c   :  { %v152_v41 = vadd.f32 %v151_v39, %v103_v38  ;;  %v132_v46 = vadd.f32 %v131_v42, %v102_v40 }
 0x11e   :  { %v199_v43 = vmul.f32 0.2, %v152_v41  ;;  %vm195_vm6 = vcmp.gt.f32.partialorder %v152_v41, 0.0  ;;  %v198_v52 = vmul.f32 0.2, %v132_v46  ;;  %vm194_vm9 = vcmp.gt.f32.partialorder %v132_v46, 0.0 }
 0x120   :  { %v203_v49 = vsel %vm195_vm6, %v152_v41, %v199_v43  ;;  %v202_v60 = vsel %vm194_vm9, %v132_v46, %v198_v52 }
 0x121   :  { %v210_v55 = vrot.slane %v203_v49, 6 }
 0x122   :  { %v171_v47 = vpop.f32.mrf.mxu2  ;;  %v191_v48 = vpop.f32.mrf.mxu3 }
 0x123   :  { %v172_v50 = vadd.f32 %v171_v47, %v104_v44  ;;  %v192_v51 = vadd.f32 %v191_v48, %v105_v45  ;;  %v214_v61 = vsel %vm213_vm10, %v202_v60, %v210_v55 }
 0x125   :  { %vm196_vm7 = vcmp.gt.f32.partialorder %v172_v50, 0.0  ;;  %v200_v53 = vmul.f32 0.2, %v172_v50  ;;  %vm197_vm8 = vcmp.gt.f32.partialorder %v192_v51, 0.0  ;;  %v201_v54 = vmul.f32 0.2, %v192_v51 }
 0x127   :  { %v204_v56 = vsel %vm196_vm7, %v172_v50, %v200_v53  ;;  %v205_v57 = vsel %vm197_vm8, %v192_v51, %v201_v54 }
 0x128   :  { %v211_v58 = vrot.slane %v204_v56, 4  ;;  %v212_v59 = vrot.slane %v205_v57, 2 }
 0x12a   :  { %v216_v62 = vsel %vm215_vm11, %v211_v58, %v212_v59 }
 0x12b   :  { %v218_v63 = vsel %vm217_vm12, %v214_v61, %v216_v62 }
 0x12c   :  { %220 = vst [vmem:[#allocation8] sm:$0xff] %v218_v63 }
 0x12d   :  { %231 = dma.vmem_to_hbm [thread:$0]  %s227_s2, 128, %s229_s30, [#allocation4]  }
 0x12e   :  { %354 = dma.done.wait [#allocation4], 128  }
 0x12f   :  { %355 = vsyncadd [#allocation4], 4294967168 }
 0x130   :  { %236 = vsyncpa [#allocation3], 1 }
 0x131   :  { %237 = vsyncpa [#allocation6], 1 }
 0x132   :  { %238 = vsyncpa [#allocation4], 1 }

</bundles_post_ra>
